<compile_context>
chip_gen: v7x
topology: tpu7x:2x2x1
jax: 0.10.0
libtpu: 0.0.40
codegen_flags: <defaults>
</compile_context>

<pallas_src>
import jax
import jax.numpy as jnp
from jax.experimental import pallas as pl
from jax.experimental.pallas import tpu as pltpu


# Smallest *normal* f32: log() is finite, and p * log(max(p, _TINY)) == 0
# exactly when p == 0 (TPU may flush subnormals, so don't use the subnormal).
_TINY = float(jnp.finfo(jnp.float32).tiny)


def _round_up(x: int, m: int) -> int:
    return ((x + m - 1) // m) * m


def _num_batch_splits() -> int:
    """2-way batch split only on multi-TensorCore chips (v7x); 1 elsewhere."""
    try:
        kind = jax.devices()[0].device_kind.lower()
    except Exception:
        return 1
    # TODO(synk): verify the leading "parallel" axis actually shards across the
    # two v7x TensorCores; switch that axis to pltpu.CORE_PARALLEL if it doesn't.
    return 2 if "v7" in kind else 1


def _vmem_capacity_bytes() -> int:
    try:
        return int(pltpu.get_tpu_info().vmem_capacity_bytes)
    except Exception:
        return 64 << 20  # conservative fallback (v7x per-core VMEM)


def _make_jsd_kernel(n_inputs: int, inv_k: float, scale: float,
                     tile_b: int, chunk_rows: int, batch_rows: int,
                     needs_mask: bool):
    """K = n_inputs distributions; scale = lambd / (batch * K)."""
    n_chunks = tile_b // chunk_rows
    groups = chunk_rows // 8

    def kernel(*refs):
        p_refs = refs[:n_inputs]
        o_ref = refs[n_inputs]          # (1, 1) SMEM partial-loss block
        acc_ref = refs[n_inputs + 1]    # (8, C) f32 VMEM accumulator

        split = pl.program_id(0)
        ti = pl.program_id(1)

        @pl.when(ti == 0)
        def _init():
            acc_ref[...] = jnp.zeros_like(acc_ref)

        tile_row0 = (split * pl.num_programs(1) + ti) * tile_b

        # Static chunk loop over the tile rows: bounds vreg live ranges while
        # keeping the DMA tile (and per-step overhead amortization) large.
        for ci in range(n_chunks):
            r0 = ci * chunk_rows
            mix = None
            plogp = None
            for r in p_refs:
                p = r[r0:r0 + chunk_rows, :].astype(jnp.float32)
                mix = p if mix is None else mix + p
                # p * log(max(p, tiny)) == 0 exactly at p == 0: no cmp/selects.
                t = p * jnp.log(jnp.maximum(p, _TINY))
                plogp = t if plogp is None else plogp + t

            # log of the clamped mixture; multiply by precomputed 1/K.
            log_mix = jnp.log(jnp.clip(mix * inv_k, 1e-7, 1.0))

            # sum_k p_k*(log p_k - log_mix) == plogp - mix * log_mix
            term = plogp - mix * log_mix

            if needs_mask:
                rows = jax.lax.broadcasted_iota(jnp.int32, (chunk_rows, 1), 0)
                valid = (tile_row0 + r0 + rows) < batch_rows
                term = jnp.where(valid, term, 0.0)

            # Fold rows in groups of 8 (pure VPU vreg adds) into the small
            # accumulator; no tile-sized accumulator stream.
            fold = term[0:8, :]
            for g in range(1, groups):
                fold = fold + term[g * 8:(g + 1) * 8, :]
            acc_ref[...] += fold

        @pl.when(ti == pl.num_programs(1) - 1)
        def _finalize():
            # Single cross-lane/sublane reduction per split.
            o_ref[0, 0] = jnp.sum(acc_ref[...]) * jnp.float32(scale)

    return kernel


def js_divergence(p0, pi_list, lambd: float = 12.0):
    """JAX/Pallas equivalent of JSDivergence.forward(p0, pi_list)."""
    ps = [p0] + list(pi_list)
    k = len(ps)
    b, c = p0.shape
    itemsize = jnp.dtype(p0.dtype).itemsize
    c_lanes = _round_up(c, 128)          # VMEM lane footprint of one block row

    num_splits = _num_batch_splits()

    # Generation-aware VMEM budget with compiler headroom.
    vmem_cap = _vmem_capacity_bytes()
    vmem_target = max(24 << 20, min(vmem_cap - (16 << 20), 96 << 20))
    input_buf_budget = vmem_target - (4 << 20)   # reserve for scratch/temps

    rows_by_vmem = max(8, (input_buf_budget // (2 * k * itemsize * c_lanes)) // 8 * 8)
    cap_rows = max(256, ((2048 * 128) // c_lanes) // 8 * 8)   # scale cap with C
    rows_needed = _round_up(max(1, -(-b // num_splits)), 8)

    # In-kernel chunk size (rows), scaled down for large C to bound live vregs.
    chunk_rows = max(8, min(256, ((256 * 128) // c_lanes) // 8 * 8, rows_needed))
    tile_b = max(chunk_rows, min(cap_rows, rows_by_vmem, rows_needed))
    tile_b = (tile_b // chunk_rows) * chunk_rows        # multiple of chunk_rows

    tiles_total = -(-b // tile_b)
    tiles_per_split = -(-tiles_total // num_splits)
    # Only emit the row mask if the grid does not tile B exactly.
    needs_mask = (num_splits * tiles_per_split * tile_b) != b

    in_spec = pl.BlockSpec(
        (tile_b, c),                                     # full C: no lane padding
        lambda ci, ti: (ci * tiles_per_split + ti, 0),
    )
    out_spec = pl.BlockSpec(
        (1, 1),
        lambda ci, ti: (ci, 0),
        memory_space=pltpu.MemorySpace.SMEM,
    )

    kernel = _make_jsd_kernel(
        n_inputs=k,
        inv_k=1.0 / float(k),
        scale=float(lambd) / (float(b) * float(k)),
        tile_b=tile_b,
        chunk_rows=chunk_rows,
        batch_rows=b,
        needs_mask=needs_mask,
    )

    # Double-buffered K input tiles + chunk-sized temporaries + accumulator.
    vmem_est = (2 * k * itemsize * tile_b * c_lanes
                + 8 * chunk_rows * c_lanes * 4
                + (2 << 20))
    vmem_limit = int(min(max(vmem_est, 24 << 20), vmem_target))

    cost = pl.CostEstimate(
        flops=int((5 * k + 4) * b * c),
        transcendentals=int((k + 1) * b * c),
        bytes_accessed=int(k * b * c * itemsize),
    )

    partials = pl.pallas_call(
        kernel,
        out_shape=jax.ShapeDtypeStruct((num_splits, 1), jnp.float32),
        grid_spec=pltpu.PrefetchScalarGridSpec(
            num_scalar_prefetch=0,
            grid=(num_splits, tiles_per_split),
            in_specs=[in_spec] * k,
            out_specs=out_spec,
            scratch_shapes=[pltpu.VMEM((8, c), jnp.float32)],
        ),
        compiler_params=pltpu.CompilerParams(
            dimension_semantics=("parallel", "arbitrary"),
            vmem_limit_bytes=vmem_limit,
        ),
        cost_estimate=cost,
    )(*ps)

    return jnp.sum(partials)


def _reference(p0, pi_list, lambd=12.0):
    # Pure-JAX reference mirroring the PyTorch module.
    k = 1 + len(pi_list)
    mix = p0
    for pi in pi_list:
        mix = mix + pi
    log_mix = jnp.log(jnp.clip(mix / k, 1e-7, 1.0))
    b = p0.shape[0]

    def kl(target):
        t = jnp.where(target > 0, target, 1.0)
        terms = jnp.where(target > 0, target * (jnp.log(t) - log_mix), 0.0)
        return jnp.sum(terms) / b

    loss = kl(p0)
    for pi in pi_list:
        loss = loss + kl(pi)
    return lambd * loss / k


if __name__ == "__main__":
    key = jax.random.PRNGKey(0)

    # Case 1: aligned shapes (B=8, C=128), K=3 distributions.
    B, C = 8, 128
    k0, k1, k2 = jax.random.split(key, 3)
    p0 = jax.nn.softmax(jax.random.normal(k0, (B, C), dtype=jnp.float32), axis=-1)
    p1 = jax.nn.softmax(jax.random.normal(k1, (B, C), dtype=jnp.float32), axis=-1)
    p2 = jax.nn.softmax(jax.random.normal(k2, (B, C), dtype=jnp.float32), axis=-1)

    out = jax.block_until_ready(js_divergence(p0, [p1, p2], lambd=12.0))
    ref = _reference(p0, [p1, p2], lambd=12.0)
    assert jnp.allclose(out, ref, rtol=5e-5, atol=1e-5), (out, ref)

    # Case 2: unaligned shapes (B=6, C=100), K=4, with exact zeros in the
    # distributions (exercises the in-kernel tail mask and the p == 0 path).
    B2, C2 = 6, 100
    keys = jax.random.split(jax.random.PRNGKey(1), 4)
    qs = [jax.nn.softmax(jax.random.normal(kk, (B2, C2), dtype=jnp.float32), axis=-1)
          for kk in keys]
    qs = [jnp.where(q > 1.0 / C2, q, 0.0) for q in qs]   # introduce exact zeros
    out2 = jax.block_until_ready(js_divergence(qs[0], qs[1:], lambd=12.0))
    ref2 = _reference(qs[0], qs[1:], lambd=12.0)
    assert jnp.allclose(out2, ref2, rtol=5e-5, atol=1e-5), (out2, ref2)

    print("KERNEL_OK")
</pallas_src>

<mosaic_0001>
module attributes {stable_mosaic.version = 11 : i64} {
  func.func @kernel(%arg0: i32, %arg1: i32, %arg2: memref<8x128xf32, #tpu.memory_space<vmem>>, %arg3: memref<8x128xf32, #tpu.memory_space<vmem>>, %arg4: memref<8x128xf32, #tpu.memory_space<vmem>>, %arg5: memref<1x1xf32, #tpu.memory_space<smem>>, %arg6: memref<8x128xf32, #tpu.memory_space<vmem>>) attributes {dimension_semantics = [#tpu.dimension_semantics<parallel>, #tpu.dimension_semantics<arbitrary>], iteration_bounds = array<i64: 1, 1>, scalar_prefetch = 0 : i64, scratch_operands = 1 : i64, tpu.core_type = #tpu.core_type<tc>, window_params = [{transform_indices = @transform_0, window_bounds = array<i64: 8, 128>}, {transform_indices = @transform_1, window_bounds = array<i64: 8, 128>}, {transform_indices = @transform_2, window_bounds = array<i64: 8, 128>}, {transform_indices = @transform_3, window_bounds = array<i64: 1, 1>}]} {
    %c0_i32 = arith.constant 0 : i32
    %0 = arith.cmpi eq, %arg1, %c0_i32 : i32
    %1 = arith.extui %0 : i1 to i32
    %c0_i32_0 = arith.constant 0 : i32
    %2 = arith.cmpi ne, %1, %c0_i32_0 : i32
    scf.if %2 {
      %cst_17 = arith.constant 0.000000e+00 : f32
      %37 = vector.broadcast %cst_17 : f32 to vector<8x128xf32>
      %c0_18 = arith.constant 0 : index
      %c0_19 = arith.constant 0 : index
      %38 = vector.load %arg6[%c0_18, %c0_19] : memref<8x128xf32, #tpu.memory_space<vmem>>, vector<8x128xf32>
      tpu.vector_store %arg6[%c0_18, %c0_19], %37 {strides = array<i32>} : memref<8x128xf32, #tpu.memory_space<vmem>>, vector<8x128xf32>,
    } else {
    }
    %c0 = arith.constant 0 : index
    %c0_1 = arith.constant 0 : index
    %3 = vector.load %arg2[%c0, %c0_1] : memref<8x128xf32, #tpu.memory_space<vmem>>, vector<8x128xf32>
    %cst = arith.constant 1.17549435E-38 : f32
    %4 = vector.broadcast %cst : f32 to vector<8x128xf32>
    %5 = arith.maximumf %3, %4 : vector<8x128xf32>
    %6 = math.log %5 : vector<8x128xf32>
    %7 = arith.mulf %3, %6 : vector<8x128xf32>
    %c0_2 = arith.constant 0 : index
    %c0_3 = arith.constant 0 : index
    %8 = vector.load %arg3[%c0_2, %c0_3] : memref<8x128xf32, #tpu.memory_space<vmem>>, vector<8x128xf32>
    %9 = arith.addf %3, %8 : vector<8x128xf32>
    %cst_4 = arith.constant 1.17549435E-38 : f32
    %10 = vector.broadcast %cst_4 : f32 to vector<8x128xf32>
    %11 = arith.maximumf %8, %10 : vector<8x128xf32>
    %12 = math.log %11 : vector<8x128xf32>
    %13 = arith.mulf %8, %12 : vector<8x128xf32>
    %14 = arith.addf %7, %13 : vector<8x128xf32>
    %c0_5 = arith.constant 0 : index
    %c0_6 = arith.constant 0 : index
    %15 = vector.load %arg4[%c0_5, %c0_6] : memref<8x128xf32, #tpu.memory_space<vmem>>, vector<8x128xf32>
    %16 = arith.addf %9, %15 : vector<8x128xf32>
    %cst_7 = arith.constant 1.17549435E-38 : f32
    %17 = vector.broadcast %cst_7 : f32 to vector<8x128xf32>
    %18 = arith.maximumf %15, %17 : vector<8x128xf32>
    %19 = math.log %18 : vector<8x128xf32>
    %20 = arith.mulf %15, %19 : vector<8x128xf32>
    %21 = arith.addf %14, %20 : vector<8x128xf32>
    %cst_8 = arith.constant 0.333333343 : f32
    %22 = vector.broadcast %cst_8 : f32 to vector<8x128xf32>
    %23 = arith.mulf %16, %22 : vector<8x128xf32>
    %cst_9 = arith.constant 1.000000e-07 : f32
    %cst_10 = arith.constant 1.000000e+00 : f32
    %24 = vector.broadcast %cst_9 : f32 to vector<8x128xf32>
    %25 = arith.maximumf %24, %23 : vector<8x128xf32>
    %26 = vector.broadcast %cst_10 : f32 to vector<8x128xf32>
    %27 = arith.minimumf %26, %25 : vector<8x128xf32>
    %28 = math.log %27 : vector<8x128xf32>
    %29 = arith.mulf %16, %28 : vector<8x128xf32>
    %30 = arith.subf %21, %29 : vector<8x128xf32>
    %c0_11 = arith.constant 0 : index
    %c0_12 = arith.constant 0 : index
    %31 = vector.load %arg6[%c0_11, %c0_12] : memref<8x128xf32, #tpu.memory_space<vmem>>, vector<8x128xf32>
    %32 = arith.addf %31, %30 : vector<8x128xf32>
    %c0_13 = arith.constant 0 : index
    %c0_14 = arith.constant 0 : index
    %33 = vector.load %arg6[%c0_13, %c0_14] : memref<8x128xf32, #tpu.memory_space<vmem>>, vector<8x128xf32>
    tpu.vector_store %arg6[%c0_13, %c0_14], %32 {strides = array<i32>} : memref<8x128xf32, #tpu.memory_space<vmem>>, vector<8x128xf32>,
    %c0_i32_15 = arith.constant 0 : i32
    %34 = arith.cmpi eq, %arg1, %c0_i32_15 : i32
    %35 = arith.extui %34 : i1 to i32
    %c0_i32_16 = arith.constant 0 : i32
    %36 = arith.cmpi ne, %35, %c0_i32_16 : i32
    scf.if %36 {
      %c0_17 = arith.constant 0 : index
      %c0_18 = arith.constant 0 : index
      %37 = vector.load %arg6[%c0_17, %c0_18] : memref<8x128xf32, #tpu.memory_space<vmem>>, vector<8x128xf32>
      %38 = vector.shape_cast %37 : vector<8x128xf32> to vector<1x8x128xf32>
      %cst_19 = arith.constant dense<0.000000e+00> : vector<1xf32>
      %39 = vector.multi_reduction <add>, %38, %cst_19 [1, 2] : vector<1x8x128xf32> to vector<1xf32>
      %40 = vector.shape_cast %39 : vector<1xf32> to vector<1x1x1xf32>
      %41 = vector.extract %40[0, 0, 0] : f32 from vector<1x1x1xf32>
      %cst_20 = arith.constant 5.000000e-01 : f32
      %42 = arith.mulf %41, %cst_20 : f32
      %c0_21 = arith.constant 0 : index
      %c0_22 = arith.constant 0 : index
      %43 = memref.load %arg5[%c0_21, %c0_22] : memref<1x1xf32, #tpu.memory_space<smem>>
      memref.store %42, %arg5[%c0_21, %c0_22] : memref<1x1xf32, #tpu.memory_space<smem>>
    } else {
    }
    return
  }
  func.func @transform_0(%arg0: i32, %arg1: i32) -> (i32, i32) {
    %c1_i32 = arith.constant 1 : i32
    %0 = arith.muli %arg0, %c1_i32 : i32
    %1 = arith.addi %0, %arg1 : i32
    %c0_i32 = arith.constant 0 : i32
    %c0_i32_0 = arith.constant 0 : i32
    return %1, %c0_i32 : i32, i32
  }
  func.func @transform_1(%arg0: i32, %arg1: i32) -> (i32, i32) {
    %c1_i32 = arith.constant 1 : i32
    %0 = arith.muli %arg0, %c1_i32 : i32
    %1 = arith.addi %0, %arg1 : i32
    %c0_i32 = arith.constant 0 : i32
    %c0_i32_0 = arith.constant 0 : i32
    return %1, %c0_i32 : i32, i32
  }
  func.func @transform_2(%arg0: i32, %arg1: i32) -> (i32, i32) {
    %c1_i32 = arith.constant 1 : i32
    %0 = arith.muli %arg0, %c1_i32 : i32
    %1 = arith.addi %0, %arg1 : i32
    %c0_i32 = arith.constant 0 : i32
    %c0_i32_0 = arith.constant 0 : i32
    return %1, %c0_i32 : i32, i32
  }
  func.func @transform_3(%arg0: i32, %arg1: i32) -> (i32, i32) {
    %c0_i32 = arith.constant 0 : i32
    %c0_i32_0 = arith.constant 0 : i32
    return %arg0, %c0_i32 : i32, i32
  }
}

</mosaic_0001>

<bundles_post_ra>
// kernel: tpu_custom_call.1
= control target key start
LH: loop header
LB: loop body
LE: loop exit
PB: predicated region body
PF: predicated region fallthrough
CT: control target
= control target key end

     0   :  { %8 = vsyncpa [#allocation4], 0  ;;  %s295_s0 = inlined_call_operand.hbm [shape: f32[8,128], index: 0, kind: input, shape index: {}]   ;;  %s296_s1 = inlined_call_operand.hbm [shape: f32[8,128], index: 1, kind: input, shape index: {}]   ;;  %s297_s2 = inlined_call_operand.hbm [shape: f32[8,128], index: 2, kind: input, shape index: {}]   ;;  %s298_s3 = inlined_call_operand.hbm [shape: f32[1,1], index: 3, kind: output, shape index: {}]  }
   0x1   :  { %9 = vsyncpa [#allocation7], 0 }
   0x2   :  { %10 = vsyncpa [#allocation5], 0  ;;  %s223_s12 = smov [#allocation6]   ;;  %s224_s14 = smov [#allocation3]  }
   0x3   :  { %s33_s13 = sshll.u32 %s223_s12, 4  ;;  %s20_s15 = sshll.u32 %s224_s14, 4  ;;  %s34_s13 = int_to_ptr.vmem [resolvable:$true] %s33_s13  ;;  %s21_s15 = int_to_ptr.vmem [resolvable:$true] %s20_s15 }
   0x4   :  { %s141_s18 = scalar_lea.hbm %s296_s1, 128 }
   0x5   :  { %p142_p0 = scmp.ne.s32.totalorder %s296_s1, %s141_s18  ;;  %p145_p1 = scmp.lt.u32.totalorder %s141_s18, %s296_s1 }
   0x7   :  { %p147_p2 = pnand %p145_p1, %p142_p0 }
   0x9   :  { %150 = shalt.err (!%p147_p2)
}
   0xa   :  { %s151_s23 = scalar_lea.vmem %s34_s13, 128  ;;  %p156_p4 = scmp.lt.s32.totalorder %s34_s13, %s34_s13 }
   0xb   :  { %p152_p3 = scmp.ne.s32.totalorder %s34_s13, %s151_s23  ;;  %p157_p5 = scmp.lt.s32.totalorder %s151_s23, %s151_s23 }
   0xd   :  { %p158_p6 = por %p157_p5, %p156_p4 }
   0xf   :  { %p159_p7 = pnand %p158_p6, %p152_p3 }
  0x11   :  { %162 = shalt.err (!%p159_p7)
}
  0x12   :  { %36 = dma.hbm_to_vmem [thread:$0]  %s296_s1, 128, %s34_s13, [#allocation7]  }
  0x13   :  { %s163_s28 = scalar_lea.hbm %s295_s0, 128 }
  0x14   :  { %p164_p8 = scmp.ne.s32.totalorder %s295_s0, %s163_s28  ;;  %p167_p9 = scmp.lt.u32.totalorder %s163_s28, %s295_s0 }
  0x16   :  { %p169_p10 = pnand %p167_p9, %p164_p8 }
  0x18   :  { %172 = shalt.err (!%p169_p10)
}
  0x19   :  { %s173_s6 = scalar_lea.vmem %s21_s15, 128  ;;  %p178_p12 = scmp.lt.s32.totalorder %s21_s15, %s21_s15 }
  0x1a   :  { %p174_p11 = scmp.ne.s32.totalorder %s21_s15, %s173_s6  ;;  %p179_p13 = scmp.lt.s32.totalorder %s173_s6, %s173_s6 }
  0x1c   :  { %p180_p0 = por %p179_p13, %p178_p12 }
  0x1e   :  { %p181_p1 = pnand %p180_p0, %p174_p11 }
  0x20   :  { %184 = shalt.err (!%p181_p1)
}
  0x21   :  { %23 = dma.hbm_to_vmem [thread:$0]  %s295_s0, 128, %s21_s15, [#allocation4]  }
  0x22   :  { %s225_s8 = smov [#allocation8]   ;;  %s185_s12 = scalar_lea.hbm %s297_s2, 128 }
  0x23   :  { %s46_s9 = sshll.u32 %s225_s8, 4  ;;  %p186_p2 = scmp.ne.s32.totalorder %s297_s2, %s185_s12  ;;  %s47_s9 = int_to_ptr.vmem [resolvable:$true] %s46_s9 }
  0x24   :  { %p189_p3 = scmp.lt.u32.totalorder %s185_s12, %s297_s2 }
  0x26   :  { %p191_p4 = pnand %p189_p3, %p186_p2 }
  0x28   :  { %194 = shalt.err (!%p191_p4)
}
  0x29   :  { %s195_s18 = scalar_lea.vmem %s47_s9, 128  ;;  %p200_p6 = scmp.lt.s32.totalorder %s47_s9, %s47_s9 }
  0x2a   :  { %p196_p5 = scmp.ne.s32.totalorder %s47_s9, %s195_s18  ;;  %p201_p7 = scmp.lt.s32.totalorder %s195_s18, %s195_s18 }
  0x2c   :  { %p202_p8 = por %p201_p7, %p200_p6 }
  0x2e   :  { %p203_p9 = pnand %p202_p8, %p196_p5 }
  0x30   :  { %206 = shalt.err (!%p203_p9)
}
  0x31   :  { %49 = dma.hbm_to_vmem [thread:$0]  %s297_s2, 128, %s47_s9, [#allocation7]  }
  0x32   :  { %217 = dma.done.wait [#allocation4], 128  }
  0x33   :  { %218 = vsyncadd [#allocation4], 4294967168 }
  0x34   :  { %219 = dma.done.wait [#allocation7], 256  }
  0x35   :  { %220 = vsyncadd [#allocation7], 4294967040  ;;  %v67_v0 = vld [vmem:[#allocation3] sm:$0xff]  ;;  %v72_v1 = vld [vmem:[#allocation6] sm:$0xff]  ;;  %s207_s22 = scalar_lea.hbm %s298_s3, 16 }
  0x36   :  { %v79_v2 = vld [vmem:[#allocation8] sm:$0xff]  ;;  %v68_v3 = vmax.f32 %v67_v0, 1.1754944e-38  ;;  %v73_v4 = vadd.f32 %v72_v1, %v67_v0  ;;  %v74_v5 = vmax.f32 %v72_v1, 1.1754944e-38  ;;  %p208_p10 = scmp.ne.s32.totalorder %s298_s3, %s207_s22  ;;  %p211_p11 = scmp.lt.u32.totalorder %s207_s22, %s298_s3 }
  0x37   :  { %v81_v6 = vmax.f32 %v79_v2, 1.1754944e-38 }
  0x38   :  { %133 = vlog2.f32 %v68_v3  ;;  %v80_v7 = vadd.f32 %v79_v2, %v73_v4  ;;  %p213_p12 = pnand %p211_p11, %p208_p10 }
  0x39   :  { %135 = vlog2.f32 %v74_v5 }
  0x3a   :  { %137 = vlog2.f32 %v81_v6  ;;  %v86_v8 = vmul.f32 0.33333334, %v80_v7 }
  0x3c   :  { %v87_v9 = vmax.f32 %v86_v8, 1e-07 }
  0x3e   :  { %v88_v10 = vmin.f32 %v87_v9, 1.0 }
  0x40   :  { %139 = vlog2.f32 %v88_v10 }
  0x42   :  { %v134_v11 = vpop.eup %133 }
  0x43   :  { %v136_v12 = vpop.eup %135  ;;  %v70_v13 = vmul.f32 0.6931472, %v134_v11 }
  0x44   :  { %v138_v14 = vpop.eup %137  ;;  %v76_v15 = vmul.f32 0.6931472, %v136_v12 }
  0x45   :  { %v71_v16 = vmul.f32 %v70_v13, %v67_v0  ;;  %v83_v17 = vmul.f32 0.6931472, %v138_v14 }
  0x46   :  { %v77_v18 = vmul.f32 %v76_v15, %v72_v1 }
  0x47   :  { %v84_v19 = vmul.f32 %v83_v17, %v79_v2 }
  0x48   :  { %v78_v20 = vadd.f32 %v77_v18, %v71_v16 }
  0x4a   :  { %v140_v21 = vpop.eup %139  ;;  %v85_v22 = vadd.f32 %v84_v19, %v78_v20 }
  0x4b   :  { %v90_v23 = vmul.f32 0.6931472, %v140_v21 }
  0x4d   :  { %v91_v24 = vmul.f32 %v90_v23, %v80_v7 }
  0x4f   :  { %v92_v25 = vsub.f32 %v85_v22, %v91_v24 }
  0x51   :  { %100 = vadd.xlane.f32.xlu0 %v92_v25 }
  0xde   :  { %v101_v26 = vpop.xlane.xlu0 %100 }
  0xdf   :  { %v102_v27 = vrot.slane %v101_v26, 4 }
  0xe1   :  { %v103_v28 = vadd.f32 %v102_v27, %v101_v26 }
  0xe3   :  { %v104_v29 = vrot.slane %v103_v28, 2 }
  0xe5   :  { %v105_v30 = vadd.f32 %v104_v29, %v103_v28 }
  0xe7   :  { %v106_v31 = vrot.slane %v105_v30, 1 }
  0xe9   :  { %v107_v32 = vadd.f32 %v106_v31, %v105_v30 }
  0xeb   :  { %127 = vpush %v107_v32 }
 0x11c   :  { %s128_s2 = spop %127 }
 0x11d   :  { %s109_s19 = smul.f32 0.5, %s128_s2 }
 0x11f   :  { %111 = sst [smem:[#allocation9]] %s109_s19 }
 0x120   :  { %216 = shalt.err (!%p213_p12)
}
 0x121   :  { %s226_s27 = smov [#allocation9]  }
 0x122   :  { %119 = dma.smem_to_hbm %s226_s27, 16, %s298_s3, [#allocation5]  }
 0x123   :  { %221 = dma.done.wait [#allocation5], 16  }
 0x124   :  { %222 = vsyncadd [#allocation5], 4294967280 }
 0x125   :  { %123 = sfence }
 0x126   :  { %124 = vsyncpa [#allocation4], 1 }
 0x127   :  { %125 = vsyncpa [#allocation7], 1 }
 0x128   :  { %126 = vsyncpa [#allocation5], 1 }

</bundles_post_ra>
